<compile_context>
chip_gen: v7x
topology: tpu7x:2x2x1
jax: 0.10.0
libtpu: 0.0.40
codegen_flags: <defaults>
</compile_context>

<pallas_src>
import jax
import jax.numpy as jnp
from jax import lax
from jax.experimental import pallas as pl
from jax.experimental.pallas import tpu as pltpu

_EPS = 1e-12  # matches torch.nn.functional.normalize default eps


def _encoder_kernel(tok_ref, emb_hbm, out_ref, seq_ref, buf_ref, dma_sem):
    """One grid step handles TB batch rows.

    tok_ref : SMEM (Bp, S) int32     scalar-prefetched token ids
    emb_hbm : HBM  (V, Hp) f32       embedding table (never copied wholesale)
    out_ref : VMEM (TB, S, Hp) f32   encoder_outputs block
    seq_ref : VMEM (TB, Hp) f32      seq_emb block
    buf_ref : VMEM (TB*S, Hp) f32    gather landing buffer
    dma_sem : scalar DMA semaphore shared by all row copies
    """
    step = pl.program_id(0)
    TB, S, Hp = out_ref.shape
    n_rows = TB * S

    # ---- DMA row gather: TB*S independent row copies HBM -> VMEM ----------
    # All copies signal the same semaphore; completion is checked with ONE
    # wait whose descriptor covers the full buffer (byte counts match).
    def issue(r):
        bb = r // S
        ss = r % S
        tok = tok_ref[step * TB + bb, ss]
        pltpu.make_async_copy(
            emb_hbm.at[pl.ds(tok, 1)], buf_ref.at[pl.ds(r, 1)], dma_sem
        ).start()

    if n_rows <= 256:
        for r in range(n_rows):          # fully unrolled for small tiles
            issue(r)
    else:
        @pl.loop(0, n_rows)              # bounded instruction footprint
        def _(r):
            issue(r)

    # Single wait for all row copies (total bytes == TB*S*Hp*4).
    pltpu.make_async_copy(buf_ref, buf_ref, dma_sem).wait()

    rows = buf_ref[...]                                        # (TB*S, Hp)

    # ---- F.normalize(p=2, dim=-1): x / max(||x||, eps) ---------------------
    # max(sqrt(ss), eps) == sqrt(max(ss, eps^2)) -> one rsqrt, exact semantics.
    sumsq = jnp.sum(rows * rows, axis=-1, keepdims=True)
    inv = lax.rsqrt(jnp.maximum(sumsq, _EPS * _EPS))
    enc = rows * inv                                           # (TB*S, Hp)
    enc3 = enc.reshape(TB, S, Hp)
    out_ref[...] = enc3

    # ---- seq_emb = normalize(mean(enc, axis=seq)) ---------------------------
    seq = jnp.sum(enc3, axis=1) * (1.0 / S)                    # (TB, Hp)
    ssq = jnp.sum(seq * seq, axis=-1, keepdims=True)
    sinv = lax.rsqrt(jnp.maximum(ssq, _EPS * _EPS))
    seq_ref[...] = seq * sinv


def encoder_forward(tokens: jax.Array, embedding: jax.Array, *, batch_block: int = 8):
    """tokens: [B, S] int, embedding: [V, H] f32 ->
       (encoder_outputs [B, S, H] f32, seq_emb [B, H] f32)"""
    B, S = tokens.shape
    V, H = embedding.shape

    # Lane-dense last dim: pad hidden to a multiple of 128.  Zero columns do
    # not change the L2 norms or the sequence mean; sliced off below.
    Hp = ((H + 127) // 128) * 128
    if Hp != H:
        embedding = jnp.pad(embedding, ((0, 0), (0, Hp - H)))
    embedding = embedding.astype(jnp.float32)

    # nn.Embedding would raise on out-of-range ids; clamp so the manual DMA
    # gather never reads out of bounds (documented behavioral difference).
    tokens = jnp.clip(tokens.astype(jnp.int32), 0, V - 1)

    # Batch blocking: TB rows per grid step; pad B up to a multiple of TB.
    TB = max(1, min(batch_block, B))
    Bp = ((B + TB - 1) // TB) * TB
    if Bp != B:
        tokens = jnp.pad(tokens, ((0, Bp - B), (0, 0)))  # pad rows use token 0

    n_rows = TB * S
    # VMEM budget: gather scratch + double-buffered output blocks (+ margin),
    # clamped to [32 MiB, 64 MiB] so it is valid on v5e/v6e/v7x alike.
    need = 4 * (n_rows * Hp + 2 * n_rows * Hp + 2 * TB * Hp)
    vmem_limit = int(min(max(need + (4 << 20), 32 << 20), 64 << 20))

    grid_spec = pltpu.PrefetchScalarGridSpec(
        num_scalar_prefetch=1,                              # tokens -> SMEM
        grid=(Bp // TB,),
        in_specs=[pl.BlockSpec(memory_space=pl.ANY)],       # table stays in HBM
        out_specs=(
            pl.BlockSpec((TB, S, Hp), lambda i, tok: (i, 0, 0)),
            pl.BlockSpec((TB, Hp), lambda i, tok: (i, 0)),
        ),
        scratch_shapes=[
            pltpu.VMEM((n_rows, Hp), jnp.float32),
            pltpu.SemaphoreType.DMA(()),
        ],
    )

    out, seq = pl.pallas_call(
        _encoder_kernel,
        grid_spec=grid_spec,
        out_shape=(
            jax.ShapeDtypeStruct((Bp, S, Hp), jnp.float32),
            jax.ShapeDtypeStruct((Bp, Hp), jnp.float32),
        ),
        compiler_params=pltpu.CompilerParams(
            # Batch-chunk axis is independent -> shard across v7x's 2 cores.
            dimension_semantics=("parallel",),
            vmem_limit_bytes=vmem_limit,
        ),
    )(tokens, embedding)

    if Bp != B or Hp != H:
        out = out[:B, :, :H]
        seq = seq[:B, :H]
    return out, seq


class Encoder:
    """JAX/Pallas counterpart of the PyTorch Encoder module."""

    def __init__(self, layers, vocab_size, hidden_size, key):
        self.layers = layers          # unused: no layer computation defined in the reference
        self.vocab_size = vocab_size
        self.hidden_size = hidden_size
        # Deterministic init mimicking nn.Embedding default (N(0, 1)).
        self.embedding = jax.random.normal(
            key, (vocab_size, hidden_size), dtype=jnp.float32)

    def __call__(self, x):
        encoder_outputs, seq_emb = encoder_forward(x, self.embedding)
        # TODO(synk): encoder_hidden / predict_value undefined in reference forward().
        return encoder_outputs, seq_emb


if __name__ == "__main__":
    key = jax.random.PRNGKey(0)
    k_emb, k_tok = jax.random.split(key)

    B, S, V, H = 2, 8, 32, 32
    enc = Encoder(layers=1, vocab_size=V, hidden_size=H, key=k_emb)
    tokens = jax.random.randint(k_tok, (B, S), 0, V, dtype=jnp.int32)

    encoder_outputs, seq_emb = enc(tokens)
    jax.block_until_ready((encoder_outputs, seq_emb))

    # quick sanity check against pure-JAX reference
    ref_emb = enc.embedding[tokens]                                   # (B, S, H)
    ref_enc = ref_emb / jnp.maximum(
        jnp.linalg.norm(ref_emb, axis=-1, keepdims=True), _EPS)
    ref_seq = jnp.mean(ref_enc, axis=1)
    ref_seq = ref_seq / jnp.maximum(
        jnp.linalg.norm(ref_seq, axis=-1, keepdims=True), _EPS)
    assert encoder_outputs.shape == (B, S, H) and seq_emb.shape == (B, H)
    assert jnp.allclose(encoder_outputs, ref_enc, atol=1e-5)
    assert jnp.allclose(seq_emb, ref_seq, atol=1e-5)

    print("KERNEL_OK")
</pallas_src>

<mosaic_0001>
module attributes {stable_mosaic.version = 11 : i64} {
  func.func @_encoder_kernel(%arg0: i32, %arg1: memref<2x8xi32, #tpu.memory_space<smem>>, %arg2: memref<32x128xf32, #tpu.memory_space<any>>, %arg3: memref<2x8x128xf32, #tpu.memory_space<vmem>>, %arg4: memref<2x128xf32, #tpu.memory_space<vmem>>, %arg5: memref<16x128xf32, #tpu.memory_space<vmem>>, %arg6: memref<!tpu.dma_semaphore, #tpu.memory_space<semaphore_mem>>) attributes {dimension_semantics = [#tpu.dimension_semantics<parallel>], iteration_bounds = array<i64: 1>, scalar_prefetch = 1 : i64, scratch_operands = 2 : i64, tpu.core_type = #tpu.core_type<tc>, window_params = [{}, {transform_indices = @transform_1, window_bounds = array<i64: 2, 8, 128>}, {transform_indices = @transform_2, window_bounds = array<i64: 2, 128>}]} {
    %c2_i32 = arith.constant 2 : i32
    %0 = arith.muli %arg0, %c2_i32 : i32
    %c0_i32 = arith.constant 0 : i32
    %1 = arith.addi %0, %c0_i32 : i32
    %2 = arith.index_cast %1 : i32 to index
    %c0 = arith.constant 0 : index
    %3 = memref.load %arg1[%2, %c0] : memref<2x8xi32, #tpu.memory_space<smem>>
    %c0_i32_0 = arith.constant 0 : i32
    %4 = tpu.memref_slice %arg2[%3, %c0_i32_0] : memref<32x128xf32, #tpu.memory_space<any>> -> memref<1x128xf32, #tpu.memory_space<any>>
    %c0_i32_1 = arith.constant 0 : i32
    %c0_i32_2 = arith.constant 0 : i32
    %5 = tpu.memref_slice %arg5[%c0_i32_1, %c0_i32_2] : memref<16x128xf32, #tpu.memory_space<vmem>> -> memref<1x128xf32, #tpu.memory_space<vmem>>
    tpu.enqueue_dma source(%4 : memref<1x128xf32, #tpu.memory_space<any>>) target(%5 : memref<1x128xf32, #tpu.memory_space<vmem>>) target_semaphore(%arg6 : memref<!tpu.dma_semaphore, #tpu.memory_space<semaphore_mem>>)
    %c2_i32_3 = arith.constant 2 : i32
    %6 = arith.muli %arg0, %c2_i32_3 : i32
    %c0_i32_4 = arith.constant 0 : i32
    %7 = arith.addi %6, %c0_i32_4 : i32
    %8 = arith.index_cast %7 : i32 to index
    %c1 = arith.constant 1 : index
    %9 = memref.load %arg1[%8, %c1] : memref<2x8xi32, #tpu.memory_space<smem>>
    %c0_i32_5 = arith.constant 0 : i32
    %10 = tpu.memref_slice %arg2[%9, %c0_i32_5] : memref<32x128xf32, #tpu.memory_space<any>> -> memref<1x128xf32, #tpu.memory_space<any>>
    %c1_i32 = arith.constant 1 : i32
    %c0_i32_6 = arith.constant 0 : i32
    %11 = tpu.memref_slice %arg5[%c1_i32, %c0_i32_6] : memref<16x128xf32, #tpu.memory_space<vmem>> -> memref<1x128xf32, #tpu.memory_space<vmem>>
    tpu.enqueue_dma source(%10 : memref<1x128xf32, #tpu.memory_space<any>>) target(%11 : memref<1x128xf32, #tpu.memory_space<vmem>>) target_semaphore(%arg6 : memref<!tpu.dma_semaphore, #tpu.memory_space<semaphore_mem>>)
    %c2_i32_7 = arith.constant 2 : i32
    %12 = arith.muli %arg0, %c2_i32_7 : i32
    %c0_i32_8 = arith.constant 0 : i32
    %13 = arith.addi %12, %c0_i32_8 : i32
    %14 = arith.index_cast %13 : i32 to index
    %c2 = arith.constant 2 : index
    %15 = memref.load %arg1[%14, %c2] : memref<2x8xi32, #tpu.memory_space<smem>>
    %c0_i32_9 = arith.constant 0 : i32
    %16 = tpu.memref_slice %arg2[%15, %c0_i32_9] : memref<32x128xf32, #tpu.memory_space<any>> -> memref<1x128xf32, #tpu.memory_space<any>>
    %c2_i32_10 = arith.constant 2 : i32
    %c0_i32_11 = arith.constant 0 : i32
    %17 = tpu.memref_slice %arg5[%c2_i32_10, %c0_i32_11] : memref<16x128xf32, #tpu.memory_space<vmem>> -> memref<1x128xf32, #tpu.memory_space<vmem>>
    tpu.enqueue_dma source(%16 : memref<1x128xf32, #tpu.memory_space<any>>) target(%17 : memref<1x128xf32, #tpu.memory_space<vmem>>) target_semaphore(%arg6 : memref<!tpu.dma_semaphore, #tpu.memory_space<semaphore_mem>>)
    %c2_i32_12 = arith.constant 2 : i32
    %18 = arith.muli %arg0, %c2_i32_12 : i32
    %c0_i32_13 = arith.constant 0 : i32
    %19 = arith.addi %18, %c0_i32_13 : i32
    %20 = arith.index_cast %19 : i32 to index
    %c3 = arith.constant 3 : index
    %21 = memref.load %arg1[%20, %c3] : memref<2x8xi32, #tpu.memory_space<smem>>
    %c0_i32_14 = arith.constant 0 : i32
    %22 = tpu.memref_slice %arg2[%21, %c0_i32_14] : memref<32x128xf32, #tpu.memory_space<any>> -> memref<1x128xf32, #tpu.memory_space<any>>
    %c3_i32 = arith.constant 3 : i32
    %c0_i32_15 = arith.constant 0 : i32
    %23 = tpu.memref_slice %arg5[%c3_i32, %c0_i32_15] : memref<16x128xf32, #tpu.memory_space<vmem>> -> memref<1x128xf32, #tpu.memory_space<vmem>>
    tpu.enqueue_dma source(%22 : memref<1x128xf32, #tpu.memory_space<any>>) target(%23 : memref<1x128xf32, #tpu.memory_space<vmem>>) target_semaphore(%arg6 : memref<!tpu.dma_semaphore, #tpu.memory_space<semaphore_mem>>)
    %c2_i32_16 = arith.constant 2 : i32
    %24 = arith.muli %arg0, %c2_i32_16 : i32
    %c0_i32_17 = arith.constant 0 : i32
    %25 = arith.addi %24, %c0_i32_17 : i32
    %26 = arith.index_cast %25 : i32 to index
    %c4 = arith.constant 4 : index
    %27 = memref.load %arg1[%26, %c4] : memref<2x8xi32, #tpu.memory_space<smem>>
    %c0_i32_18 = arith.constant 0 : i32
    %28 = tpu.memref_slice %arg2[%27, %c0_i32_18] : memref<32x128xf32, #tpu.memory_space<any>> -> memref<1x128xf32, #tpu.memory_space<any>>
    %c4_i32 = arith.constant 4 : i32
    %c0_i32_19 = arith.constant 0 : i32
    %29 = tpu.memref_slice %arg5[%c4_i32, %c0_i32_19] : memref<16x128xf32, #tpu.memory_space<vmem>> -> memref<1x128xf32, #tpu.memory_space<vmem>>
    tpu.enqueue_dma source(%28 : memref<1x128xf32, #tpu.memory_space<any>>) target(%29 : memref<1x128xf32, #tpu.memory_space<vmem>>) target_semaphore(%arg6 : memref<!tpu.dma_semaphore, #tpu.memory_space<semaphore_mem>>)
    %c2_i32_20 = arith.constant 2 : i32
    %30 = arith.muli %arg0, %c2_i32_20 : i32
    %c0_i32_21 = arith.constant 0 : i32
    %31 = arith.addi %30, %c0_i32_21 : i32
    %32 = arith.index_cast %31 : i32 to index
    %c5 = arith.constant 5 : index
    %33 = memref.load %arg1[%32, %c5] : memref<2x8xi32, #tpu.memory_space<smem>>
    %c0_i32_22 = arith.constant 0 : i32
    %34 = tpu.memref_slice %arg2[%33, %c0_i32_22] : memref<32x128xf32, #tpu.memory_space<any>> -> memref<1x128xf32, #tpu.memory_space<any>>
    %c5_i32 = arith.constant 5 : i32
    %c0_i32_23 = arith.constant 0 : i32
    %35 = tpu.memref_slice %arg5[%c5_i32, %c0_i32_23] : memref<16x128xf32, #tpu.memory_space<vmem>> -> memref<1x128xf32, #tpu.memory_space<vmem>>
    tpu.enqueue_dma source(%34 : memref<1x128xf32, #tpu.memory_space<any>>) target(%35 : memref<1x128xf32, #tpu.memory_space<vmem>>) target_semaphore(%arg6 : memref<!tpu.dma_semaphore, #tpu.memory_space<semaphore_mem>>)
    %c2_i32_24 = arith.constant 2 : i32
    %36 = arith.muli %arg0, %c2_i32_24 : i32
    %c0_i32_25 = arith.constant 0 : i32
    %37 = arith.addi %36, %c0_i32_25 : i32
    %38 = arith.index_cast %37 : i32 to index
    %c6 = arith.constant 6 : index
    %39 = memref.load %arg1[%38, %c6] : memref<2x8xi32, #tpu.memory_space<smem>>
    %c0_i32_26 = arith.constant 0 : i32
    %40 = tpu.memref_slice %arg2[%39, %c0_i32_26] : memref<32x128xf32, #tpu.memory_space<any>> -> memref<1x128xf32, #tpu.memory_space<any>>
    %c6_i32 = arith.constant 6 : i32
    %c0_i32_27 = arith.constant 0 : i32
    %41 = tpu.memref_slice %arg5[%c6_i32, %c0_i32_27] : memref<16x128xf32, #tpu.memory_space<vmem>> -> memref<1x128xf32, #tpu.memory_space<vmem>>
    tpu.enqueue_dma source(%40 : memref<1x128xf32, #tpu.memory_space<any>>) target(%41 : memref<1x128xf32, #tpu.memory_space<vmem>>) target_semaphore(%arg6 : memref<!tpu.dma_semaphore, #tpu.memory_space<semaphore_mem>>)
    %c2_i32_28 = arith.constant 2 : i32
    %42 = arith.muli %arg0, %c2_i32_28 : i32
    %c0_i32_29 = arith.constant 0 : i32
    %43 = arith.addi %42, %c0_i32_29 : i32
    %44 = arith.index_cast %43 : i32 to index
    %c7 = arith.constant 7 : index
    %45 = memref.load %arg1[%44, %c7] : memref<2x8xi32, #tpu.memory_space<smem>>
    %c0_i32_30 = arith.constant 0 : i32
    %46 = tpu.memref_slice %arg2[%45, %c0_i32_30] : memref<32x128xf32, #tpu.memory_space<any>> -> memref<1x128xf32, #tpu.memory_space<any>>
    %c7_i32 = arith.constant 7 : i32
    %c0_i32_31 = arith.constant 0 : i32
    %47 = tpu.memref_slice %arg5[%c7_i32, %c0_i32_31] : memref<16x128xf32, #tpu.memory_space<vmem>> -> memref<1x128xf32, #tpu.memory_space<vmem>>
    tpu.enqueue_dma source(%46 : memref<1x128xf32, #tpu.memory_space<any>>) target(%47 : memref<1x128xf32, #tpu.memory_space<vmem>>) target_semaphore(%arg6 : memref<!tpu.dma_semaphore, #tpu.memory_space<semaphore_mem>>)
    %c2_i32_32 = arith.constant 2 : i32
    %48 = arith.muli %arg0, %c2_i32_32 : i32
    %c1_i32_33 = arith.constant 1 : i32
    %49 = arith.addi %48, %c1_i32_33 : i32
    %50 = arith.index_cast %49 : i32 to index
    %c0_34 = arith.constant 0 : index
    %51 = memref.load %arg1[%50, %c0_34] : memref<2x8xi32, #tpu.memory_space<smem>>
    %c0_i32_35 = arith.constant 0 : i32
    %52 = tpu.memref_slice %arg2[%51, %c0_i32_35] : memref<32x128xf32, #tpu.memory_space<any>> -> memref<1x128xf32, #tpu.memory_space<any>>
    %c8_i32 = arith.constant 8 : i32
    %c0_i32_36 = arith.constant 0 : i32
    %53 = tpu.memref_slice %arg5[%c8_i32, %c0_i32_36] : memref<16x128xf32, #tpu.memory_space<vmem>> -> memref<1x128xf32, #tpu.memory_space<vmem>>
    tpu.enqueue_dma source(%52 : memref<1x128xf32, #tpu.memory_space<any>>) target(%53 : memref<1x128xf32, #tpu.memory_space<vmem>>) target_semaphore(%arg6 : memref<!tpu.dma_semaphore, #tpu.memory_space<semaphore_mem>>)
    %c2_i32_37 = arith.constant 2 : i32
    %54 = arith.muli %arg0, %c2_i32_37 : i32
    %c1_i32_38 = arith.constant 1 : i32
    %55 = arith.addi %54, %c1_i32_38 : i32
    %56 = arith.index_cast %55 : i32 to index
    %c1_39 = arith.constant 1 : index
    %57 = memref.load %arg1[%56, %c1_39] : memref<2x8xi32, #tpu.memory_space<smem>>
    %c0_i32_40 = arith.constant 0 : i32
    %58 = tpu.memref_slice %arg2[%57, %c0_i32_40] : memref<32x128xf32, #tpu.memory_space<any>> -> memref<1x128xf32, #tpu.memory_space<any>>
    %c9_i32 = arith.constant 9 : i32
    %c0_i32_41 = arith.constant 0 : i32
    %59 = tpu.memref_slice %arg5[%c9_i32, %c0_i32_41] : memref<16x128xf32, #tpu.memory_space<vmem>> -> memref<1x128xf32, #tpu.memory_space<vmem>>
    tpu.enqueue_dma source(%58 : memref<1x128xf32, #tpu.memory_space<any>>) target(%59 : memref<1x128xf32, #tpu.memory_space<vmem>>) target_semaphore(%arg6 : memref<!tpu.dma_semaphore, #tpu.memory_space<semaphore_mem>>)
    %c2_i32_42 = arith.constant 2 : i32
    %60 = arith.muli %arg0, %c2_i32_42 : i32
    %c1_i32_43 = arith.constant 1 : i32
    %61 = arith.addi %60, %c1_i32_43 : i32
    %62 = arith.index_cast %61 : i32 to index
    %c2_44 = arith.constant 2 : index
    %63 = memref.load %arg1[%62, %c2_44] : memref<2x8xi32, #tpu.memory_space<smem>>
    %c0_i32_45 = arith.constant 0 : i32
    %64 = tpu.memref_slice %arg2[%63, %c0_i32_45] : memref<32x128xf32, #tpu.memory_space<any>> -> memref<1x128xf32, #tpu.memory_space<any>>
    %c10_i32 = arith.constant 10 : i32
    %c0_i32_46 = arith.constant 0 : i32
    %65 = tpu.memref_slice %arg5[%c10_i32, %c0_i32_46] : memref<16x128xf32, #tpu.memory_space<vmem>> -> memref<1x128xf32, #tpu.memory_space<vmem>>
    tpu.enqueue_dma source(%64 : memref<1x128xf32, #tpu.memory_space<any>>) target(%65 : memref<1x128xf32, #tpu.memory_space<vmem>>) target_semaphore(%arg6 : memref<!tpu.dma_semaphore, #tpu.memory_space<semaphore_mem>>)
    %c2_i32_47 = arith.constant 2 : i32
    %66 = arith.muli %arg0, %c2_i32_47 : i32
    %c1_i32_48 = arith.constant 1 : i32
    %67 = arith.addi %66, %c1_i32_48 : i32
    %68 = arith.index_cast %67 : i32 to index
    %c3_49 = arith.constant 3 : index
    %69 = memref.load %arg1[%68, %c3_49] : memref<2x8xi32, #tpu.memory_space<smem>>
    %c0_i32_50 = arith.constant 0 : i32
    %70 = tpu.memref_slice %arg2[%69, %c0_i32_50] : memref<32x128xf32, #tpu.memory_space<any>> -> memref<1x128xf32, #tpu.memory_space<any>>
    %c11_i32 = arith.constant 11 : i32
    %c0_i32_51 = arith.constant 0 : i32
    %71 = tpu.memref_slice %arg5[%c11_i32, %c0_i32_51] : memref<16x128xf32, #tpu.memory_space<vmem>> -> memref<1x128xf32, #tpu.memory_space<vmem>>
    tpu.enqueue_dma source(%70 : memref<1x128xf32, #tpu.memory_space<any>>) target(%71 : memref<1x128xf32, #tpu.memory_space<vmem>>) target_semaphore(%arg6 : memref<!tpu.dma_semaphore, #tpu.memory_space<semaphore_mem>>)
    %c2_i32_52 = arith.constant 2 : i32
    %72 = arith.muli %arg0, %c2_i32_52 : i32
    %c1_i32_53 = arith.constant 1 : i32
    %73 = arith.addi %72, %c1_i32_53 : i32
    %74 = arith.index_cast %73 : i32 to index
    %c4_54 = arith.constant 4 : index
    %75 = memref.load %arg1[%74, %c4_54] : memref<2x8xi32, #tpu.memory_space<smem>>
    %c0_i32_55 = arith.constant 0 : i32
    %76 = tpu.memref_slice %arg2[%75, %c0_i32_55] : memref<32x128xf32, #tpu.memory_space<any>> -> memref<1x128xf32, #tpu.memory_space<any>>
    %c12_i32 = arith.constant 12 : i32
    %c0_i32_56 = arith.constant 0 : i32
    %77 = tpu.memref_slice %arg5[%c12_i32, %c0_i32_56] : memref<16x128xf32, #tpu.memory_space<vmem>> -> memref<1x128xf32, #tpu.memory_space<vmem>>
    tpu.enqueue_dma source(%76 : memref<1x128xf32, #tpu.memory_space<any>>) target(%77 : memref<1x128xf32, #tpu.memory_space<vmem>>) target_semaphore(%arg6 : memref<!tpu.dma_semaphore, #tpu.memory_space<semaphore_mem>>)
    %c2_i32_57 = arith.constant 2 : i32
    %78 = arith.muli %arg0, %c2_i32_57 : i32
    %c1_i32_58 = arith.constant 1 : i32
    %79 = arith.addi %78, %c1_i32_58 : i32
    %80 = arith.index_cast %79 : i32 to index
    %c5_59 = arith.constant 5 : index
    %81 = memref.load %arg1[%80, %c5_59] : memref<2x8xi32, #tpu.memory_space<smem>>
    %c0_i32_60 = arith.constant 0 : i32
    %82 = tpu.memref_slice %arg2[%81, %c0_i32_60] : memref<32x128xf32, #tpu.memory_space<any>> -> memref<1x128xf32, #tpu.memory_space<any>>
    %c13_i32 = arith.constant 13 : i32
    %c0_i32_61 = arith.constant 0 : i32
    %83 = tpu.memref_slice %arg5[%c13_i32, %c0_i32_61] : memref<16x128xf32, #tpu.memory_space<vmem>> -> memref<1x128xf32, #tpu.memory_space<vmem>>
    tpu.enqueue_dma source(%82 : memref<1x128xf32, #tpu.memory_space<any>>) target(%83 : memref<1x128xf32, #tpu.memory_space<vmem>>) target_semaphore(%arg6 : memref<!tpu.dma_semaphore, #tpu.memory_space<semaphore_mem>>)
    %c2_i32_62 = arith.constant 2 : i32
    %84 = arith.muli %arg0, %c2_i32_62 : i32
    %c1_i32_63 = arith.constant 1 : i32
    %85 = arith.addi %84, %c1_i32_63 : i32
    %86 = arith.index_cast %85 : i32 to index
    %c6_64 = arith.constant 6 : index
    %87 = memref.load %arg1[%86, %c6_64] : memref<2x8xi32, #tpu.memory_space<smem>>
    %c0_i32_65 = arith.constant 0 : i32
    %88 = tpu.memref_slice %arg2[%87, %c0_i32_65] : memref<32x128xf32, #tpu.memory_space<any>> -> memref<1x128xf32, #tpu.memory_space<any>>
    %c14_i32 = arith.constant 14 : i32
    %c0_i32_66 = arith.constant 0 : i32
    %89 = tpu.memref_slice %arg5[%c14_i32, %c0_i32_66] : memref<16x128xf32, #tpu.memory_space<vmem>> -> memref<1x128xf32, #tpu.memory_space<vmem>>
    tpu.enqueue_dma source(%88 : memref<1x128xf32, #tpu.memory_space<any>>) target(%89 : memref<1x128xf32, #tpu.memory_space<vmem>>) target_semaphore(%arg6 : memref<!tpu.dma_semaphore, #tpu.memory_space<semaphore_mem>>)
    %c2_i32_67 = arith.constant 2 : i32
    %90 = arith.muli %arg0, %c2_i32_67 : i32
    %c1_i32_68 = arith.constant 1 : i32
    %91 = arith.addi %90, %c1_i32_68 : i32
    %92 = arith.index_cast %91 : i32 to index
    %c7_69 = arith.constant 7 : index
    %93 = memref.load %arg1[%92, %c7_69] : memref<2x8xi32, #tpu.memory_space<smem>>
    %c0_i32_70 = arith.constant 0 : i32
    %94 = tpu.memref_slice %arg2[%93, %c0_i32_70] : memref<32x128xf32, #tpu.memory_space<any>> -> memref<1x128xf32, #tpu.memory_space<any>>
    %c15_i32 = arith.constant 15 : i32
    %c0_i32_71 = arith.constant 0 : i32
    %95 = tpu.memref_slice %arg5[%c15_i32, %c0_i32_71] : memref<16x128xf32, #tpu.memory_space<vmem>> -> memref<1x128xf32, #tpu.memory_space<vmem>>
    tpu.enqueue_dma source(%94 : memref<1x128xf32, #tpu.memory_space<any>>) target(%95 : memref<1x128xf32, #tpu.memory_space<vmem>>) target_semaphore(%arg6 : memref<!tpu.dma_semaphore, #tpu.memory_space<semaphore_mem>>)
    tpu.wait_dma2 semaphore(%arg6 : memref<!tpu.dma_semaphore, #tpu.memory_space<semaphore_mem>>) src(%arg5 : memref<16x128xf32, #tpu.memory_space<vmem>>) dst(%arg5 : memref<16x128xf32, #tpu.memory_space<vmem>>)
    %c0_72 = arith.constant 0 : index
    %c0_73 = arith.constant 0 : index
    %96 = vector.load %arg5[%c0_72, %c0_73] : memref<16x128xf32, #tpu.memory_space<vmem>>, vector<16x128xf32>
    %97 = arith.mulf %96, %96 : vector<16x128xf32>
    %cst = arith.constant dense<0.000000e+00> : vector<16xf32>
    %98 = vector.multi_reduction <add>, %97, %cst [1] : vector<16x128xf32> to vector<16xf32>
    %99 = vector.shape_cast %98 : vector<16xf32> to vector<16x1xf32>
    %cst_74 = arith.constant 1.000000e-24 : f32
    %100 = vector.broadcast %cst_74 : f32 to vector<16x1xf32>
    %101 = arith.maximumf %99, %100 : vector<16x1xf32>
    %102 = math.rsqrt %101 : vector<16x1xf32>
    %103 = vector.broadcast %102 : vector<16x1xf32> to vector<16x128xf32>
    %104 = arith.mulf %96, %103 : vector<16x128xf32>
    %105 = vector.shape_cast %104 : vector<16x128xf32> to vector<2x8x128xf32>
    %c0_75 = arith.constant 0 : index
    %c0_76 = arith.constant 0 : index
    %c0_77 = arith.constant 0 : index
    %106 = vector.load %arg3[%c0_75, %c0_76, %c0_77] : memref<2x8x128xf32, #tpu.memory_space<vmem>>, vector<2x8x128xf32>
    tpu.vector_store %arg3[%c0_75, %c0_76, %c0_77], %105 {strides = array<i32>} : memref<2x8x128xf32, #tpu.memory_space<vmem>>, vector<2x8x128xf32>,
    %cst_78 = arith.constant dense<0.000000e+00> : vector<2x128xf32>
    %107 = vector.multi_reduction <add>, %105, %cst_78 [1] : vector<2x8x128xf32> to vector<2x128xf32>
    %cst_79 = arith.constant 1.250000e-01 : f32
    %108 = vector.broadcast %cst_79 : f32 to vector<2x128xf32>
    %109 = arith.mulf %107, %108 : vector<2x128xf32>
    %110 = arith.mulf %109, %109 : vector<2x128xf32>
    %cst_80 = arith.constant dense<0.000000e+00> : vector<2xf32>
    %111 = vector.multi_reduction <add>, %110, %cst_80 [1] : vector<2x128xf32> to vector<2xf32>
    %112 = vector.shape_cast %111 : vector<2xf32> to vector<2x1xf32>
    %cst_81 = arith.constant 1.000000e-24 : f32
    %113 = vector.broadcast %cst_81 : f32 to vector<2x1xf32>
    %114 = arith.maximumf %112, %113 : vector<2x1xf32>
    %115 = math.rsqrt %114 : vector<2x1xf32>
    %116 = vector.broadcast %115 : vector<2x1xf32> to vector<2x128xf32>
    %117 = arith.mulf %109, %116 : vector<2x128xf32>
    %c0_82 = arith.constant 0 : index
    %c0_83 = arith.constant 0 : index
    %118 = vector.load %arg4[%c0_82, %c0_83] : memref<2x128xf32, #tpu.memory_space<vmem>>, vector<2x128xf32>
    tpu.vector_store %arg4[%c0_82, %c0_83], %117 {strides = array<i32>} : memref<2x128xf32, #tpu.memory_space<vmem>>, vector<2x128xf32>,
    return
  }
  func.func @transform_1(%arg0: i32, %arg1: memref<2x8xi32, #tpu.memory_space<smem>>) -> (i32, i32, i32) {
    %c0_i32 = arith.constant 0 : i32
    %c0_i32_0 = arith.constant 0 : i32
    %c0_i32_1 = arith.constant 0 : i32
    return %arg0, %c0_i32, %c0_i32_0 : i32, i32, i32
  }
  func.func @transform_2(%arg0: i32, %arg1: memref<2x8xi32, #tpu.memory_space<smem>>) -> (i32, i32) {
    %c0_i32 = arith.constant 0 : i32
    %c0_i32_0 = arith.constant 0 : i32
    return %arg0, %c0_i32 : i32, i32
  }
}

</mosaic_0001>

<bundles_post_ra>
// kernel: tpu_custom_call.1
= control target key start
LH: loop header
LB: loop body
LE: loop exit
PB: predicated region body
PF: predicated region fallthrough
CT: control target
= control target key end

     0   :  { %s1245_s0 = inlined_call_operand.hbm [shape: s32[2,8], index: 0, kind: input, shape index: {}]   ;;  %s1246_s1 = inlined_call_operand.hbm [shape: f32[32,128], index: 1, kind: input, shape index: {}]   ;;  %s1247_s2 = inlined_call_operand.hbm [shape: f32[2,8,128], index: 2, kind: output, shape index: {0}]   ;;  %s1248_s3 = inlined_call_operand.hbm [shape: f32[2,128], index: 3, kind: output, shape index: {1}]  }
   0x1   :  { %s457_s14 = scalar_lea.hbm %s1245_s0, 32 }
   0x2   :  { %p458_p0 = scmp.ne.s32.totalorder %s1245_s0, %s457_s14  ;;  %p461_p1 = scmp.lt.u32.totalorder %s457_s14, %s1245_s0 }
   0x4   :  { %p463_p2 = pnand %p461_p1, %p458_p0 }
   0x6   :  { %466 = shalt.err (!%p463_p2)  }
   0x7   :  { %s903_s19 = smov [#allocation5]  }
   0x8   :  { %10 = dma.hbm_to_smem %s1245_s0, 32, %s903_s19, [#allocation4] }
   0x9   :  { %895 = dma.done.wait [#allocation4], 32 }
   0xa   :  { %896 = vsyncadd [#allocation4], 4294967264 }
   0xb   :  { %12 = sfence }
   0xc   :  { %13 = vsyncpa [#allocation7], 0 }
   0xd   :  { %14 = vsyncpa [#allocation9], 0  ;;  %s17_s22 = sld [smem:[#allocation5]]  ;;  %s904_s23 = smov [#allocation2]  }
   0xe   :  { %s27_s24 = sshll.u32 %s904_s23, 4  ;;  %s956_s25 = sld [smem:[#allocation5 + $0x1]]  ;;  %s958_s24 = int_to_ptr.vmem [resolvable:$true] %s27_s24 }
   0xf   :  { %s905_s26 = smov [#allocation2 + $0x1]   ;;  %s960_s28 = sld [smem:[#allocation5 + $0x2]] }
  0x10   :  { %s43_s27 = sshll.u32 %s905_s26, 4  ;;  %s906_s0 = smov [#allocation2 + $0x2]   ;;  %s962_s27 = int_to_ptr.vmem [resolvable:$true] %s43_s27 }
  0x11   :  { %s59_s29 = sshll.u32 %s906_s0, 4  ;;  %s964_s30 = sld [smem:[#allocation5 + $0x3]]  ;;  %s966_s29 = int_to_ptr.vmem [resolvable:$true] %s59_s29 }
  0x12   :  { %s975_s12 = scalar_lea.hbm %s1246_s1, 512 }
  0x13   :  { %s398_s4 = sshll.u32 %s17_s22, 4 }
  0x14   :  { %s19_s7 = scalar_lea.hbm %s1246_s1, %s398_s4  ;;  %s400_s8 = sshll.u32 %s956_s25, 4 }
  0x15   :  { %s467_s9 = scalar_lea.hbm %s19_s7, 16  ;;  %p470_p4 = scmp.lt.u32.totalorder %s19_s7, %s1246_s1 }
  0x16   :  { %p468_p3 = scmp.ne.s32.totalorder %s19_s7, %s467_s9  ;;  %p471_p5 = scmp.lt.u32.totalorder %s975_s12, %s467_s9 }
  0x17   :  { %p473_p7 = scmp.lt.u32.totalorder %s467_s9, %s19_s7 }
  0x18   :  { %p472_p6 = por %p471_p5, %p470_p4 }
  0x1a   :  { %p474_p8 = por %p473_p7, %p472_p6 }
  0x1c   :  { %p475_p9 = pnand %p474_p8, %p468_p3 }
  0x1e   :  { %478 = shalt.err (!%p475_p9)  }
  0x1f   :  { %s479_s15 = scalar_lea.vmem %s958_s24, 16  ;;  %s984_s16 = scalar_lea.vmem %s958_s24, 256 }
  0x20   :  { %p480_p10 = scmp.ne.s32.totalorder %s958_s24, %s479_s15  ;;  %p484_p11 = scmp.lt.s32.totalorder %s958_s24, %s958_s24 }
  0x21   :  { %p485_p12 = scmp.lt.s32.totalorder %s984_s16, %s479_s15 }
  0x23   :  { %p486_p13 = por %p485_p12, %p484_p11 }
  0x25   :  { %p487_p0 = pnand %p486_p13, %p480_p10 }
  0x27   :  { %490 = shalt.err (!%p487_p0)  }
  0x28   :  { %30 = dma.hbm_to_vmem [thread:$0]  %s19_s7, 16, %s958_s24, [#allocation3] }
  0x29   :  { %s34_s19 = scalar_lea.hbm %s1246_s1, %s400_s8  ;;  %s402_s20 = sshll.u32 %s960_s28, 4 }
  0x2a   :  { %s491_s21 = scalar_lea.hbm %s34_s19, 16  ;;  %p494_p2 = scmp.lt.u32.totalorder %s34_s19, %s1246_s1 }
  0x2b   :  { %p492_p1 = scmp.ne.s32.totalorder %s34_s19, %s491_s21  ;;  %p495_p3 = scmp.lt.u32.totalorder %s975_s12, %s491_s21 }
  0x2c   :  { %p497_p5 = scmp.lt.u32.totalorder %s491_s21, %s34_s19 }
  0x2d   :  { %p496_p4 = por %p495_p3, %p494_p2 }
  0x2f   :  { %p498_p6 = por %p497_p5, %p496_p4 }
  0x31   :  { %p499_p7 = pnand %p498_p6, %p492_p1 }
  0x33   :  { %502 = shalt.err (!%p499_p7)  }
  0x34   :  { %s503_s25 = scalar_lea.vmem %s962_s27, 16  ;;  %p508_p9 = scmp.lt.s32.totalorder %s962_s27, %s958_s24 }
  0x35   :  { %p504_p8 = scmp.ne.s32.totalorder %s962_s27, %s503_s25  ;;  %p509_p10 = scmp.lt.s32.totalorder %s984_s16, %s503_s25 }
  0x37   :  { %p510_p11 = por %p509_p10, %p508_p9 }
  0x39   :  { %p511_p12 = pnand %p510_p11, %p504_p8 }
  0x3b   :  { %514 = shalt.err (!%p511_p12)  }
  0x3c   :  { %46 = dma.hbm_to_vmem [thread:$0]  %s34_s19, 16, %s962_s27, [#allocation3] }
  0x3d   :  { %s50_s0 = scalar_lea.hbm %s1246_s1, %s402_s20  ;;  %s404_s4 = sshll.u32 %s964_s30, 4 }
  0x3e   :  { %s515_s5 = scalar_lea.hbm %s50_s0, 16  ;;  %p518_p0 = scmp.lt.u32.totalorder %s50_s0, %s1246_s1 }
  0x3f   :  { %p516_p13 = scmp.ne.s32.totalorder %s50_s0, %s515_s5  ;;  %p519_p1 = scmp.lt.u32.totalorder %s975_s12, %s515_s5 }
  0x40   :  { %p521_p3 = scmp.lt.u32.totalorder %s515_s5, %s50_s0 }
  0x41   :  { %p520_p2 = por %p519_p1, %p518_p0 }
  0x43   :  { %p522_p4 = por %p521_p3, %p520_p2 }
  0x45   :  { %p523_p5 = pnand %p522_p4, %p516_p13 }
  0x47   :  { %526 = shalt.err (!%p523_p5)  }
  0x48   :  { %s527_s27 = scalar_lea.vmem %s966_s29, 16  ;;  %p532_p7 = scmp.lt.s32.totalorder %s966_s29, %s958_s24 }
  0x49   :  { %p528_p6 = scmp.ne.s32.totalorder %s966_s29, %s527_s27  ;;  %p533_p8 = scmp.lt.s32.totalorder %s984_s16, %s527_s27 }
  0x4b   :  { %p534_p9 = por %p533_p8, %p532_p7 }
  0x4d   :  { %p535_p10 = pnand %p534_p9, %p528_p6 }
  0x4f   :  { %538 = shalt.err (!%p535_p10)  }
  0x50   :  { %62 = dma.hbm_to_vmem [thread:$0]  %s50_s0, 16, %s966_s29, [#allocation3] }
  0x51   :  { %s66_s9 = scalar_lea.hbm %s1246_s1, %s404_s4  ;;  %s907_s10 = smov [#allocation2 + $0x3]  }
  0x52   :  { %s75_s11 = sshll.u32 %s907_s10, 4  ;;  %s1021_s13 = sld [smem:[#allocation5 + $0x4]]  ;;  %s76_s11 = int_to_ptr.vmem [resolvable:$true] %s75_s11 }
  0x53   :  { %s539_s14 = scalar_lea.hbm %s66_s9, 16  ;;  %p542_p12 = scmp.lt.u32.totalorder %s66_s9, %s1246_s1 }
  0x54   :  { %p540_p11 = scmp.ne.s32.totalorder %s66_s9, %s539_s14  ;;  %p543_p13 = scmp.lt.u32.totalorder %s975_s12, %s539_s14 }
  0x55   :  { %p545_p1 = scmp.lt.u32.totalorder %s539_s14, %s66_s9 }
  0x56   :  { %p544_p0 = por %p543_p13, %p542_p12 }
  0x58   :  { %p546_p2 = por %p545_p1, %p544_p0 }
  0x5a   :  { %p547_p3 = pnand %p546_p2, %p540_p11 }
  0x5c   :  { %550 = shalt.err (!%p547_p3)  }
  0x5d   :  { %s551_s29 = scalar_lea.vmem %s76_s11, 16  ;;  %p556_p5 = scmp.lt.s32.totalorder %s76_s11, %s958_s24 }
  0x5e   :  { %p552_p4 = scmp.ne.s32.totalorder %s76_s11, %s551_s29  ;;  %p557_p6 = scmp.lt.s32.totalorder %s984_s16, %s551_s29 }
  0x60   :  { %p558_p7 = por %p557_p6, %p556_p5 }
  0x62   :  { %p559_p8 = pnand %p558_p7, %p552_p4 }
  0x64   :  { %562 = shalt.err (!%p559_p8)  }
  0x65   :  { %78 = dma.hbm_to_vmem [thread:$0]  %s66_s9, 16, %s76_s11, [#allocation3] }
  0x66   :  { %s908_s18 = smov [#allocation2 + $0x4]   ;;  %s1029_s20 = sld [smem:[#allocation5 + $0x5]] }
  0x67   :  { %s91_s19 = sshll.u32 %s908_s18, 4  ;;  %s909_s21 = smov [#allocation2 + $0x5]   ;;  %s92_s19 = int_to_ptr.vmem [resolvable:$true] %s91_s19 }
  0x68   :  { %s107_s22 = sshll.u32 %s909_s21, 4  ;;  %s1031_s23 = sld [smem:[#allocation5 + $0x6]]  ;;  %s1034_s22 = int_to_ptr.vmem [resolvable:$true] %s107_s22 }
  0x69   :  { %s406_s25 = sshll.u32 %s1021_s13, 4 }
  0x6a   :  { %s82_s0 = scalar_lea.hbm %s1246_s1, %s406_s25 }
  0x6b   :  { %s563_s4 = scalar_lea.hbm %s82_s0, 16  ;;  %p566_p10 = scmp.lt.u32.totalorder %s82_s0, %s1246_s1 }
  0x6c   :  { %p564_p9 = scmp.ne.s32.totalorder %s82_s0, %s563_s4  ;;  %p567_p11 = scmp.lt.u32.totalorder %s975_s12, %s563_s4 }
  0x6d   :  { %p569_p13 = scmp.lt.u32.totalorder %s563_s4, %s82_s0 }
  0x6e   :  { %p568_p12 = por %p567_p11, %p566_p10 }
  0x70   :  { %p570_p0 = por %p569_p13, %p568_p12 }
  0x72   :  { %p571_p1 = pnand %p570_p0, %p564_p9 }
  0x74   :  { %574 = shalt.err (!%p571_p1)  }
  0x75   :  { %s575_s7 = scalar_lea.vmem %s92_s19, 16  ;;  %p580_p3 = scmp.lt.s32.totalorder %s92_s19, %s958_s24 }
  0x76   :  { %p576_p2 = scmp.ne.s32.totalorder %s92_s19, %s575_s7  ;;  %p581_p4 = scmp.lt.s32.totalorder %s984_s16, %s575_s7 }
  0x78   :  { %p582_p5 = por %p581_p4, %p580_p3 }
  0x7a   :  { %p583_p6 = pnand %p582_p5, %p576_p2 }
  0x7c   :  { %586 = shalt.err (!%p583_p6)  }
  0x7d   :  { %94 = dma.hbm_to_vmem [thread:$0]  %s82_s0, 16, %s92_s19, [#allocation3] }
  0x7e   :  { %s408_s27 = sshll.u32 %s1029_s20, 4  ;;  %s910_s30 = smov [#allocation2 + $0x6]  }
  0x7f   :  { %s123_s8 = sshll.u32 %s910_s30, 4  ;;  %s98_s11 = scalar_lea.hbm %s1246_s1, %s408_s27  ;;  %s1049_s8 = int_to_ptr.vmem [resolvable:$true] %s123_s8 }
  0x80   :  { %s587_s13 = scalar_lea.hbm %s98_s11, 16  ;;  %p590_p8 = scmp.lt.u32.totalorder %s98_s11, %s1246_s1 }
  0x81   :  { %p588_p7 = scmp.ne.s32.totalorder %s98_s11, %s587_s13  ;;  %p591_p9 = scmp.lt.u32.totalorder %s975_s12, %s587_s13 }
  0x82   :  { %p593_p11 = scmp.lt.u32.totalorder %s587_s13, %s98_s11 }
  0x83   :  { %p592_p10 = por %p591_p9, %p590_p8 }
  0x85   :  { %p594_p12 = por %p593_p11, %p592_p10 }
  0x87   :  { %p595_p13 = pnand %p594_p12, %p588_p7 }
  0x89   :  { %598 = shalt.err (!%p595_p13)  }
  0x8a   :  { %s599_s17 = scalar_lea.vmem %s1034_s22, 16  ;;  %p604_p1 = scmp.lt.s32.totalorder %s1034_s22, %s958_s24 }
  0x8b   :  { %p600_p0 = scmp.ne.s32.totalorder %s1034_s22, %s599_s17  ;;  %p605_p2 = scmp.lt.s32.totalorder %s984_s16, %s599_s17 }
  0x8d   :  { %p606_p3 = por %p605_p2, %p604_p1 }
  0x8f   :  { %p607_p4 = pnand %p606_p3, %p600_p0 }
  0x91   :  { %610 = shalt.err (!%p607_p4)  }
  0x92   :  { %110 = dma.hbm_to_vmem [thread:$0]  %s98_s11, 16, %s1034_s22, [#allocation3] }
  0x93   :  { %s410_s29 = sshll.u32 %s1031_s23, 4  ;;  %s1062_s18 = sld [smem:[#allocation5 + $0x7]] }
  0x94   :  { %s114_s21 = scalar_lea.hbm %s1246_s1, %s410_s29 }
  0x95   :  { %s611_s25 = scalar_lea.hbm %s114_s21, 16  ;;  %p614_p6 = scmp.lt.u32.totalorder %s114_s21, %s1246_s1 }
  0x96   :  { %p612_p5 = scmp.ne.s32.totalorder %s114_s21, %s611_s25  ;;  %p615_p7 = scmp.lt.u32.totalorder %s975_s12, %s611_s25 }
  0x97   :  { %p617_p9 = scmp.lt.u32.totalorder %s611_s25, %s114_s21 }
  0x98   :  { %p616_p8 = por %p615_p7, %p614_p6 }
  0x9a   :  { %p618_p10 = por %p617_p9, %p616_p8 }
  0x9c   :  { %p619_p11 = pnand %p618_p10, %p612_p5 }
  0x9e   :  { %622 = shalt.err (!%p619_p11)  }
  0x9f   :  { %s623_s22 = scalar_lea.vmem %s1049_s8, 16  ;;  %p628_p13 = scmp.lt.s32.totalorder %s1049_s8, %s958_s24 }
  0xa0   :  { %p624_p12 = scmp.ne.s32.totalorder %s1049_s8, %s623_s22  ;;  %p629_p0 = scmp.lt.s32.totalorder %s984_s16, %s623_s22 }
  0xa2   :  { %p630_p1 = por %p629_p0, %p628_p13 }
  0xa4   :  { %p631_p2 = pnand %p630_p1, %p624_p12 }
  0xa6   :  { %634 = shalt.err (!%p631_p2)  }
  0xa7   :  { %126 = dma.hbm_to_vmem [thread:$0]  %s114_s21, 16, %s1049_s8, [#allocation3] }
  0xa8   :  { %s911_s23 = smov [#allocation2 + $0x7]   ;;  %s1077_s4 = sld [smem:[#allocation5 + $0x80]] }
  0xa9   :  { %s139_s0 = sshll.u32 %s911_s23, 4  ;;  %s912_s5 = smov [#allocation2 + $0x8]   ;;  %s140_s0 = int_to_ptr.vmem [resolvable:$true] %s139_s0 }
  0xaa   :  { %s156_s6 = sshll.u32 %s912_s5, 4  ;;  %s1079_s7 = sld [smem:[#allocation5 + $0x81]]  ;;  %s1082_s6 = int_to_ptr.vmem [resolvable:$true] %s156_s6 }
  0xab   :  { %s412_s27 = sshll.u32 %s1062_s18, 4 }
  0xac   :  { %s130_s10 = scalar_lea.hbm %s1246_s1, %s412_s27 }
  0xad   :  { %s635_s11 = scalar_lea.hbm %s130_s10, 16  ;;  %p638_p4 = scmp.lt.u32.totalorder %s130_s10, %s1246_s1 }
  0xae   :  { %p636_p3 = scmp.ne.s32.totalorder %s130_s10, %s635_s11  ;;  %p639_p5 = scmp.lt.u32.totalorder %s975_s12, %s635_s11 }
  0xaf   :  { %p641_p7 = scmp.lt.u32.totalorder %s635_s11, %s130_s10 }
  0xb0   :  { %p640_p6 = por %p639_p5, %p638_p4 }
  0xb2   :  { %p642_p8 = por %p641_p7, %p640_p6 }
  0xb4   :  { %p643_p9 = pnand %p642_p8, %p636_p3 }
  0xb6   :  { %646 = shalt.err (!%p643_p9)  }
  0xb7   :  { %s647_s14 = scalar_lea.vmem %s140_s0, 16  ;;  %p652_p11 = scmp.lt.s32.totalorder %s140_s0, %s958_s24 }
  0xb8   :  { %p648_p10 = scmp.ne.s32.totalorder %s140_s0, %s647_s14  ;;  %p653_p12 = scmp.lt.s32.totalorder %s984_s16, %s647_s14 }
  0xba   :  { %p654_p13 = por %p653_p12, %p652_p11 }
  0xbc   :  { %p655_p0 = pnand %p654_p13, %p648_p10 }
  0xbe   :  { %658 = shalt.err (!%p655_p0)  }
  0xbf   :  { %142 = dma.hbm_to_vmem [thread:$0]  %s130_s10, 16, %s140_s0, [#allocation3] }
  0xc0   :  { %s414_s15 = sshll.u32 %s1077_s4, 4  ;;  %s913_s17 = smov [#allocation2 + $0x9]  }
  0xc1   :  { %s172_s29 = sshll.u32 %s913_s17, 4  ;;  %s147_s20 = scalar_lea.hbm %s1246_s1, %s414_s15  ;;  %s1097_s29 = int_to_ptr.vmem [resolvable:$true] %s172_s29 }
  0xc2   :  { %s659_s21 = scalar_lea.hbm %s147_s20, 16  ;;  %p662_p2 = scmp.lt.u32.totalorder %s147_s20, %s1246_s1 }
  0xc3   :  { %p660_p1 = scmp.ne.s32.totalorder %s147_s20, %s659_s21  ;;  %p663_p3 = scmp.lt.u32.totalorder %s975_s12, %s659_s21 }
  0xc4   :  { %p665_p5 = scmp.lt.u32.totalorder %s659_s21, %s147_s20 }
  0xc5   :  { %p664_p4 = por %p663_p3, %p662_p2 }
  0xc7   :  { %p666_p6 = por %p665_p5, %p664_p4 }
  0xc9   :  { %p667_p7 = pnand %p666_p6, %p660_p1 }
  0xcb   :  { %670 = shalt.err (!%p667_p7)  }
  0xcc   :  { %s671_s28 = scalar_lea.vmem %s1082_s6, 16  ;;  %p676_p9 = scmp.lt.s32.totalorder %s1082_s6, %s958_s24 }
  0xcd   :  { %p672_p8 = scmp.ne.s32.totalorder %s1082_s6, %s671_s28  ;;  %p677_p10 = scmp.lt.s32.totalorder %s984_s16, %s671_s28 }
  0xcf   :  { %p678_p11 = por %p677_p10, %p676_p9 }
  0xd1   :  { %p679_p12 = pnand %p678_p11, %p672_p8 }
  0xd3   :  { %682 = shalt.err (!%p679_p12)  }
  0xd4   :  { %159 = dma.hbm_to_vmem [thread:$0]  %s147_s20, 16, %s1082_s6, [#allocation3] }
  0xd5   :  { %s416_s22 = sshll.u32 %s1079_s7, 4  ;;  %s1110_s23 = sld [smem:[#allocation5 + $0x82]] }
  0xd6   :  { %s163_s5 = scalar_lea.hbm %s1246_s1, %s416_s22 }
  0xd7   :  { %s683_s27 = scalar_lea.hbm %s163_s5, 16  ;;  %p686_p0 = scmp.lt.u32.totalorder %s163_s5, %s1246_s1 }
  0xd8   :  { %p684_p13 = scmp.ne.s32.totalorder %s163_s5, %s683_s27  ;;  %p687_p1 = scmp.lt.u32.totalorder %s975_s12, %s683_s27 }
  0xd9   :  { %p689_p3 = scmp.lt.u32.totalorder %s683_s27, %s163_s5 }
  0xda   :  { %p688_p2 = por %p687_p1, %p686_p0 }
  0xdc   :  { %p690_p4 = por %p689_p3, %p688_p2 }
  0xde   :  { %p691_p5 = pnand %p690_p4, %p684_p13 }
  0xe0   :  { %694 = shalt.err (!%p691_p5)  }
  0xe1   :  { %s695_s6 = scalar_lea.vmem %s1097_s29, 16  ;;  %p700_p7 = scmp.lt.s32.totalorder %s1097_s29, %s958_s24 }
  0xe2   :  { %p696_p6 = scmp.ne.s32.totalorder %s1097_s29, %s695_s6  ;;  %p701_p8 = scmp.lt.s32.totalorder %s984_s16, %s695_s6 }
  0xe4   :  { %p702_p9 = por %p701_p8, %p700_p7 }
  0xe6   :  { %p703_p10 = pnand %p702_p9, %p696_p6 }
  0xe8   :  { %706 = shalt.err (!%p703_p10)  }
  0xe9   :  { %175 = dma.hbm_to_vmem [thread:$0]  %s163_s5, 16, %s1097_s29, [#allocation3] }
  0xea   :  { %s914_s7 = smov [#allocation2 + $0xa]   ;;  %s1125_s11 = sld [smem:[#allocation5 + $0x83]] }
  0xeb   :  { %s188_s10 = sshll.u32 %s914_s7, 4  ;;  %s915_s13 = smov [#allocation2 + $0xb]   ;;  %s189_s10 = int_to_ptr.vmem [resolvable:$true] %s188_s10 }
  0xec   :  { %s204_s8 = sshll.u32 %s915_s13, 4  ;;  %s1127_s14 = sld [smem:[#allocation5 + $0x84]]  ;;  %s1130_s8 = int_to_ptr.vmem [resolvable:$true] %s204_s8 }
  0xed   :  { %s418_s15 = sshll.u32 %s1110_s23, 4 }
  0xee   :  { %s179_s19 = scalar_lea.hbm %s1246_s1, %s418_s15 }
  0xef   :  { %s707_s20 = scalar_lea.hbm %s179_s19, 16  ;;  %p710_p12 = scmp.lt.u32.totalorder %s179_s19, %s1246_s1 }
  0xf0   :  { %p708_p11 = scmp.ne.s32.totalorder %s179_s19, %s707_s20  ;;  %p711_p13 = scmp.lt.u32.totalorder %s975_s12, %s707_s20 }
  0xf1   :  { %p713_p1 = scmp.lt.u32.totalorder %s707_s20, %s179_s19 }
  0xf2   :  { %p712_p0 = por %p711_p13, %p710_p12 }
  0xf4   :  { %p714_p2 = por %p713_p1, %p712_p0 }
  0xf6   :  { %p715_p3 = pnand %p714_p2, %p708_p11 }
  0xf8   :  { %718 = shalt.err (!%p715_p3)  }
  0xf9   :  { %s719_s25 = scalar_lea.vmem %s189_s10, 16  ;;  %p724_p5 = scmp.lt.s32.totalorder %s189_s10, %s958_s24 }
  0xfa   :  { %p720_p4 = scmp.ne.s32.totalorder %s189_s10, %s719_s25  ;;  %p725_p6 = scmp.lt.s32.totalorder %s984_s16, %s719_s25 }
  0xfc   :  { %p726_p7 = por %p725_p6, %p724_p5 }
  0xfe   :  { %p727_p8 = pnand %p726_p7, %p720_p4 }
 0x100   :  { %730 = shalt.err (!%p727_p8)  }
 0x101   :  { %191 = dma.hbm_to_vmem [thread:$0]  %s179_s19, 16, %s189_s10, [#allocation3] }
 0x102   :  { %s420_s26 = sshll.u32 %s1125_s11, 4  ;;  %s916_s28 = smov [#allocation2 + $0xc]  }
 0x103   :  { %s220_s22 = sshll.u32 %s916_s28, 4  ;;  %s195_s4 = scalar_lea.hbm %s1246_s1, %s420_s26  ;;  %s1145_s22 = int_to_ptr.vmem [resolvable:$true] %s220_s22 }
 0x104   :  { %s731_s5 = scalar_lea.hbm %s195_s4, 16  ;;  %p734_p10 = scmp.lt.u32.totalorder %s195_s4, %s1246_s1 }
 0x105   :  { %p732_p9 = scmp.ne.s32.totalorder %s195_s4, %s731_s5  ;;  %p735_p11 = scmp.lt.u32.totalorder %s975_s12, %s731_s5 }
 0x106   :  { %p737_p13 = scmp.lt.u32.totalorder %s731_s5, %s195_s4 }
 0x107   :  { %p736_p12 = por %p735_p11, %p734_p10 }
 0x109   :  { %p738_p0 = por %p737_p13, %p736_p12 }
 0x10b   :  { %p739_p1 = pnand %p738_p0, %p732_p9 }
 0x10d   :  { %742 = shalt.err (!%p739_p1)  }
 0x10e   :  { %s743_s9 = scalar_lea.vmem %s1130_s8, 16  ;;  %p748_p3 = scmp.lt.s32.totalorder %s1130_s8, %s958_s24 }
 0x10f   :  { %p744_p2 = scmp.ne.s32.totalorder %s1130_s8, %s743_s9  ;;  %p749_p4 = scmp.lt.s32.totalorder %s984_s16, %s743_s9 }
 0x111   :  { %p750_p5 = por %p749_p4, %p748_p3 }
 0x113   :  { %p751_p6 = pnand %p750_p5, %p744_p2 }
 0x115   :  { %754 = shalt.err (!%p751_p6)  }
 0x116   :  { %207 = dma.hbm_to_vmem [thread:$0]  %s195_s4, 16, %s1130_s8, [#allocation3] }
 0x117   :  { %s422_s6 = sshll.u32 %s1127_s14, 4  ;;  %s1158_s7 = sld [smem:[#allocation5 + $0x85]] }
 0x118   :  { %s211_s13 = scalar_lea.hbm %s1246_s1, %s422_s6 }
 0x119   :  { %s755_s15 = scalar_lea.hbm %s211_s13, 16  ;;  %p758_p8 = scmp.lt.u32.totalorder %s211_s13, %s1246_s1 }
 0x11a   :  { %p756_p7 = scmp.ne.s32.totalorder %s211_s13, %s755_s15  ;;  %p759_p9 = scmp.lt.u32.totalorder %s975_s12, %s755_s15 }
 0x11b   :  { %p761_p11 = scmp.lt.u32.totalorder %s755_s15, %s211_s13 }
 0x11c   :  { %p760_p10 = por %p759_p9, %p758_p8 }
 0x11e   :  { %p762_p12 = por %p761_p11, %p760_p10 }
 0x120   :  { %p763_p13 = pnand %p762_p12, %p756_p7 }
 0x122   :  { %766 = shalt.err (!%p763_p13)  }
 0x123   :  { %s767_s8 = scalar_lea.vmem %s1145_s22, 16  ;;  %p772_p1 = scmp.lt.s32.totalorder %s1145_s22, %s958_s24 }
 0x124   :  { %p768_p0 = scmp.ne.s32.totalorder %s1145_s22, %s767_s8  ;;  %p773_p2 = scmp.lt.s32.totalorder %s984_s16, %s767_s8 }
 0x126   :  { %p774_p3 = por %p773_p2, %p772_p1 }
 0x128   :  { %p775_p4 = pnand %p774_p3, %p768_p0 }
 0x12a   :  { %778 = shalt.err (!%p775_p4)  }
 0x12b   :  { %223 = dma.hbm_to_vmem [thread:$0]  %s211_s13, 16, %s1145_s22, [#allocation3] }
 0x12c   :  { %s917_s14 = smov [#allocation2 + $0xd]   ;;  %s1173_s20 = sld [smem:[#allocation5 + $0x86]] }
 0x12d   :  { %s236_s19 = sshll.u32 %s917_s14, 4  ;;  %s918_s21 = smov [#allocation2 + $0xe]   ;;  %s237_s19 = int_to_ptr.vmem [resolvable:$true] %s236_s19 }
 0x12e   :  { %s252_s29 = sshll.u32 %s918_s21, 4  ;;  %s1175_s25 = sld [smem:[#allocation5 + $0x87]]  ;;  %s1178_s29 = int_to_ptr.vmem [resolvable:$true] %s252_s29 }
 0x12f   :  { %s424_s26 = sshll.u32 %s1158_s7, 4 }
 0x130   :  { %s227_s0 = scalar_lea.hbm %s1246_s1, %s424_s26 }
 0x131   :  { %s779_s4 = scalar_lea.hbm %s227_s0, 16  ;;  %p782_p6 = scmp.lt.u32.totalorder %s227_s0, %s1246_s1 }
 0x132   :  { %p780_p5 = scmp.ne.s32.totalorder %s227_s0, %s779_s4  ;;  %p783_p7 = scmp.lt.u32.totalorder %s975_s12, %s779_s4 }
 0x133   :  { %p785_p9 = scmp.lt.u32.totalorder %s779_s4, %s227_s0 }
 0x134   :  { %p784_p8 = por %p783_p7, %p782_p6 }
 0x136   :  { %p786_p10 = por %p785_p9, %p784_p8 }
 0x138   :  { %p787_p11 = pnand %p786_p10, %p780_p5 }
 0x13a   :  { %790 = shalt.err (!%p787_p11)  }
 0x13b   :  { %s791_s27 = scalar_lea.vmem %s237_s19, 16  ;;  %p796_p13 = scmp.lt.s32.totalorder %s237_s19, %s958_s24 }
 0x13c   :  { %p792_p12 = scmp.ne.s32.totalorder %s237_s19, %s791_s27  ;;  %p797_p0 = scmp.lt.s32.totalorder %s984_s16, %s791_s27 }
 0x13e   :  { %p798_p1 = por %p797_p0, %p796_p13 }
 0x140   :  { %p799_p2 = pnand %p798_p1, %p792_p12 }
 0x142   :  { %802 = shalt.err (!%p799_p2)  }
 0x143   :  { %239 = dma.hbm_to_vmem [thread:$0]  %s227_s0, 16, %s237_s19, [#allocation3] }
 0x144   :  { %s426_s30 = sshll.u32 %s1173_s20, 4  ;;  %s919_s9 = smov [#allocation2 + $0xf]  }
 0x145   :  { %s268_s6 = sshll.u32 %s919_s9, 4  ;;  %s243_s11 = scalar_lea.hbm %s1246_s1, %s426_s30  ;;  %s1193_s6 = int_to_ptr.vmem [resolvable:$true] %s268_s6 }
 0x146   :  { %s803_s13 = scalar_lea.hbm %s243_s11, 16  ;;  %p806_p4 = scmp.lt.u32.totalorder %s243_s11, %s1246_s1 }
 0x147   :  { %p804_p3 = scmp.ne.s32.totalorder %s243_s11, %s803_s13  ;;  %p807_p5 = scmp.lt.u32.totalorder %s975_s12, %s803_s13 }
 0x148   :  { %p809_p7 = scmp.lt.u32.totalorder %s803_s13, %s243_s11 }
 0x149   :  { %p808_p6 = por %p807_p5, %p806_p4 }
 0x14b   :  { %p810_p8 = por %p809_p7, %p808_p6 }
 0x14d   :  { %p811_p9 = pnand %p810_p8, %p804_p3 }
 0x14f   :  { %814 = shalt.err (!%p811_p9)  }
 0x150   :  { %s815_s18 = scalar_lea.vmem %s1178_s29, 16  ;;  %p820_p11 = scmp.lt.s32.totalorder %s1178_s29, %s958_s24 }
 0x151   :  { %p816_p10 = scmp.ne.s32.totalorder %s1178_s29, %s815_s18  ;;  %p821_p12 = scmp.lt.s32.totalorder %s984_s16, %s815_s18 }
 0x153   :  { %p822_p13 = por %p821_p12, %p820_p11 }
 0x155   :  { %p823_p0 = pnand %p822_p13, %p816_p10 }
 0x157   :  { %826 = shalt.err (!%p823_p0)  }
 0x158   :  { %255 = dma.hbm_to_vmem [thread:$0]  %s243_s11, 16, %s1178_s29, [#allocation3] }
 0x159   :  { %s428_s8 = sshll.u32 %s1175_s25, 4 }
 0x15a   :  { %s259_s20 = scalar_lea.hbm %s1246_s1, %s428_s8 }
 0x15b   :  { %s827_s21 = scalar_lea.hbm %s259_s20, 16  ;;  %p830_p2 = scmp.lt.u32.totalorder %s259_s20, %s1246_s1 }
 0x15c   :  { %p828_p1 = scmp.ne.s32.totalorder %s259_s20, %s827_s21  ;;  %p831_p3 = scmp.lt.u32.totalorder %s975_s12, %s827_s21 }
 0x15d   :  { %p833_p5 = scmp.lt.u32.totalorder %s827_s21, %s259_s20 }
 0x15e   :  { %p832_p4 = por %p831_p3, %p830_p2 }
 0x160   :  { %p834_p6 = por %p833_p5, %p832_p4 }
 0x162   :  { %p835_p7 = pnand %p834_p6, %p828_p1 }
 0x164   :  { %838 = shalt.err (!%p835_p7)  }
 0x165   :  { %s839_s29 = scalar_lea.vmem %s1193_s6, 16  ;;  %p844_p9 = scmp.lt.s32.totalorder %s1193_s6, %s958_s24 }
 0x166   :  { %p840_p8 = scmp.ne.s32.totalorder %s1193_s6, %s839_s29  ;;  %p845_p10 = scmp.lt.s32.totalorder %s984_s16, %s839_s29 }
 0x168   :  { %p846_p11 = por %p845_p10, %p844_p9 }
 0x16a   :  { %p847_p12 = pnand %p846_p11, %p840_p8 }
 0x16c   :  { %850 = shalt.err (!%p847_p12)  }
 0x16d   :  { %271 = dma.hbm_to_vmem [thread:$0]  %s259_s20, 16, %s1193_s6, [#allocation3] }
 0x16e   :  { %897 = dma.done.wait [#allocation3], 256 }
 0x16f   :  { %898 = vsyncadd [#allocation3], 4294967040  ;;  %v275_v0 = vld [vmem:[#allocation2] sm:$0xff]  ;;  %v276_v1 = vld [vmem:[#allocation2 + $0x8] sm:$0xff]  ;;  %vm309_vm0 = vcmask 1041409   ;;  %vm312_vm1 = vcmask 1041408  }
 0x170   :  { %v277_v2 = vmul.f32 %v275_v0, %v275_v0  ;;  %v278_v3 = vmul.f32 %v276_v1, %v276_v1  ;;  %s920_s1 = smov [#allocation6]  }
 0x171   :  { %s335_s24 = sshll.u32 %s920_s1, 4  ;;  %s336_s24 = int_to_ptr.vmem [resolvable:$true] %s335_s24 }
 0x172   :  { %279 = vadd.xlane.f32.xlu0 %v277_v2  ;;  %s851_s12 = scalar_lea.vmem %s336_s24, 256  ;;  %p856_p0 = scmp.lt.s32.totalorder %s336_s24, %s336_s24 }
 0x173   :  { %p852_p13 = scmp.ne.s32.totalorder %s336_s24, %s851_s12  ;;  %p857_p1 = scmp.lt.s32.totalorder %s851_s12, %s851_s12 }
 0x175   :  { %p858_p2 = por %p857_p1, %p856_p0 }
 0x176   :  { %281 = vadd.xlane.f32.xlu0 %v278_v3 }
 0x177   :  { %p859_p3 = pnand %p858_p2, %p852_p13 }
 0x1ff   :  { %v280_v4 = vpop.xlane.xlu0 %279 }
 0x200   :  { %v283_v5 = vmax.f32 %v280_v4, 1e-24 }
 0x202   :  { %451 = vrsqrt.f32 %v283_v5 }
 0x203   :  { %v282_v6 = vpop.xlane.xlu0 %281 }
 0x204   :  { %v284_v7 = vmax.f32 %v282_v6, 1e-24 }
 0x206   :  { %453 = vrsqrt.f32 %v284_v7 }
 0x20c   :  { %v452_v8 = vpop.eup %451 }
 0x20d   :  { %v287_v9 = vmul.f32 %v452_v8, %v275_v0 }
 0x20f   :  { %289 = vst [vmem:[#allocation6] sm:$0xff] %v287_v9  ;;  %v291_v10 = vrot.slane %v287_v9, 4 }
 0x210   :  { %v454_v11 = vpop.eup %453 }
 0x211   :  { %v288_v12 = vmul.f32 %v454_v11, %v276_v1  ;;  %v292_v13 = vadd.f32 %v291_v10, %v287_v9 }
 0x213   :  { %290 = vst [vmem:[#allocation6 + $0x8] sm:$0xff] %v288_v12  ;;  %v293_v14 = vrot.slane %v292_v13, 2  ;;  %v297_v15 = vrot.slane %v288_v12, 4 }
 0x215   :  { %v294_v16 = vadd.f32 %v293_v14, %v292_v13  ;;  %v298_v17 = vadd.f32 %v297_v15, %v288_v12 }
 0x217   :  { %v295_v18 = vrot.slane %v294_v16, 1  ;;  %v299_v19 = vrot.slane %v298_v17, 2 }
 0x219   :  { %v296_v20 = vadd.f32 %v295_v18, %v294_v16  ;;  %v300_v21 = vadd.f32 %v299_v19, %v298_v17 }
 0x21b   :  { %v301_v22 = vrot.slane %v300_v21, 1  ;;  %v303_v24 = vmul.f32 0.125, %v296_v20 }
 0x21d   :  { %v302_v23 = vadd.f32 %v301_v22, %v300_v21  ;;  %v305_v26 = vmul.f32 %v303_v24, %v303_v24 }
 0x21f   :  { %v304_v25 = vmul.f32 0.125, %v302_v23 }
 0x221   :  { %v306_v27 = vmul.f32 %v304_v25, %v304_v25 }
 0x223   :  { %v310_v28 = vsel %vm309_vm0, %v306_v27, %v305_v26 }
 0x224   :  { %v313_v29 = vsel %vm312_vm1, %v310_v28, 0.0 }
 0x225   :  { %314 = vadd.xlane.f32.xlu1 %v313_v29 }
 0x226   :  { %862 = shalt.err (!%p859_p3)
}
 0x227   :  { %s863_s23 = scalar_lea.hbm %s1247_s2, 256 }
 0x228   :  { %p864_p4 = scmp.ne.s32.totalorder %s1247_s2, %s863_s23  ;;  %p867_p5 = scmp.lt.u32.totalorder %s863_s23, %s1247_s2 }
 0x22a   :  { %p869_p6 = pnand %p867_p5, %p864_p4 }
 0x22c   :  { %872 = shalt.err (!%p869_p6)
}
 0x22d   :  { %s921_s27 = smov 128   ;;  %s922_s30 = smov 8  }
 0x22e   :  { %341 = dma.vmem_to_hbm [thread:$0]  %s336_s24, 256, %s1247_s2, [#allocation7], %s921_s27, %s921_s27, %s922_s30  }
 0x22f   :  { %s923_s7 = smov [#allocation8]  }
 0x230   :  { %s348_s10 = sshll.u32 %s923_s7, 4  ;;  %s349_s10 = int_to_ptr.vmem [resolvable:$true] %s348_s10 }
 0x231   :  { %s873_s11 = scalar_lea.vmem %s349_s10, 32  ;;  %p878_p8 = scmp.lt.s32.totalorder %s349_s10, %s349_s10 }
 0x232   :  { %p874_p7 = scmp.ne.s32.totalorder %s349_s10, %s873_s11  ;;  %p879_p9 = scmp.lt.s32.totalorder %s873_s11, %s873_s11 }
 0x234   :  { %p880_p10 = por %p879_p9, %p878_p8 }
 0x236   :  { %p881_p11 = pnand %p880_p10, %p874_p7 }
 0x2b2   :  { %v315_v30 = vpop.xlane.xlu1 %314 }
 0x2b3   :  { %v316_v31 = vmax.f32 %v315_v30, 1e-24 }
 0x2b5   :  { %455 = vrsqrt.f32 %v316_v31 }
 0x2bf   :  { %v456_v32 = vpop.eup %455 }
 0x2c0   :  { %v319_v33 = vrot.slane %v456_v32, 1  ;;  %v322_v35 = vmul.f32 %v456_v32, %v303_v24 }
 0x2c2   :  { %v323_v34 = vmul.f32 %v319_v33, %v304_v25 }
 0x2c4   :  { %v326_v36 = vrot.slane %v323_v34, 7 }
 0x2c6   :  { %v327_v37 = vsel %vm309_vm0, %v326_v36, %v322_v35 }
 0x2c7   :  { %329 = vst [vmem:[#allocation8] sm:$0x3] %v327_v37 }
 0x2c8   :  { %884 = shalt.err (!%p881_p11)
}
 0x2c9   :  { %s885_s15 = scalar_lea.hbm %s1248_s3, 32 }
 0x2ca   :  { %p886_p12 = scmp.ne.s32.totalorder %s1248_s3, %s885_s15  ;;  %p889_p13 = scmp.lt.u32.totalorder %s885_s15, %s1248_s3 }
 0x2cc   :  { %p891_p0 = pnand %p889_p13, %p886_p12 }
 0x2ce   :  { %894 = shalt.err (!%p891_p0)
}
 0x2cf   :  { %351 = dma.vmem_to_hbm [thread:$0]  %s349_s10, 32, %s1248_s3, [#allocation9]  }
 0x2d0   :  { %899 = dma.done.wait [#allocation7], 256  }
 0x2d1   :  { %900 = vsyncadd [#allocation7], 4294967040 }
 0x2d2   :  { %901 = dma.done.wait [#allocation9], 32  }
 0x2d3   :  { %902 = vsyncadd [#allocation9], 4294967264 }
 0x2d4   :  { %358 = vsyncpa [#allocation7], 1 }
 0x2d5   :  { %359 = vsyncpa [#allocation9], 1 }
 0x2d6   :  { %360 = vsyncmov [#allocation3] }
 0x2d9   :  { %s361_s21 = vpop.sfrf %360 }
 0x2da   :  { %p429_p1 = scmp.ne.s32.totalorder %s361_s21, 0 }
 0x2dc   :  { %365 = shalt.err (%p429_p1)  }

</bundles_post_ra>
